<compile_context>
chip_gen: v6e
topology: v6e:2x2x1
jax: 0.10.0
libtpu: 0.0.40
codegen_flags: <defaults>
</compile_context>

<pallas_src>
import jax
import jax.numpy as jnp
from jax.experimental import pallas as pl
from jax.experimental.pallas import tpu as pltpu


# ---------------------------------------------------------------------------
# Kernel
# ---------------------------------------------------------------------------
def _normalize_kernel(x_ref, scale_ref, bias_ref, o_ref):
    """o = x * scale_row + bias_row, broadcast over the lane axis."""
    x = x_ref[...]
    if jnp.issubdtype(x_ref.dtype, jnp.floating):
        # Compute in the input precision (bf16 VPU on v6e/v7x; on v5e the
        # compiler upcasts internally, still correct).
        s = scale_ref[...].astype(x_ref.dtype)
        b = bias_ref[...].astype(x_ref.dtype)
        y = x * s + b
    else:
        # Integer images: promote to f32, like torch's int - float promotion.
        y = x.astype(jnp.float32) * scale_ref[...] + bias_ref[...]
    o_ref[...] = y.astype(o_ref.dtype)


# ---------------------------------------------------------------------------
# Blocking policy
# ---------------------------------------------------------------------------
_TARGET_TILE_BYTES = 4 << 20   # ~4 MiB per tile per array (mem-bound sweet spot)
_MIN_TILE_BYTES = 512 << 10    # don't bother shrinking below this
_MIN_GRID_STEPS = 8            # keep some steps for megacore / 2-TC sharding


def _row_split_factor(nc, hw, max_factor=64):
    """Smallest r dividing hw such that (nc * r) % 8 == 0 (perfect sublane
    packing). Falls back to 1 if no such factor exists."""
    if nc % 8 == 0:
        return 1
    for r in range(2, max_factor + 1):
        if hw % r == 0 and (nc * r) % 8 == 0:
            return r
    return 1


def _choose_blocks(rows, cols, itemsize):
    """Pick (bm, bn) so one tile is ~_TARGET_TILE_BYTES, bn a multiple of 128
    (or the full column extent), bm a multiple of 8 (or the full row extent)."""
    total = rows * cols * itemsize
    budget = min(_TARGET_TILE_BYTES,
                 max(total // _MIN_GRID_STEPS, _MIN_TILE_BYTES))

    # Column block: prefer the full lane extent (keeps stores unmasked and the
    # param columns resident); shrink to a multiple of 128 only if an 8-row
    # stripe at full width would blow the budget.
    if cols <= 128 or cols * 8 * itemsize <= budget:
        bn = cols
    else:
        bn = max(128, (budget // (8 * itemsize)) // 128 * 128)
        bn = min(bn, (cols // 128) * 128)

    # Row block: as many rows as fit the budget at this width.
    row_budget = max(1, budget // (bn * itemsize))
    if rows <= row_budget:
        bm = rows
    else:
        bm = max(8, (row_budget // 8) * 8)
    return bm, bn


# ---------------------------------------------------------------------------
# Wrapper
# ---------------------------------------------------------------------------
def normalize_nchw(img, mean, std):
    """Pallas-backed per-channel normalization of an NCHW tensor."""
    n, c, h, w = img.shape
    nc, hw = n * c, h * w

    mean = jnp.asarray(mean, jnp.float32).reshape(-1)
    std = jnp.asarray(std, jnp.float32).reshape(-1)
    assert mean.shape[0] == c and std.shape[0] == c, "mean/std must have C entries"

    out_dtype = img.dtype if jnp.issubdtype(img.dtype, jnp.floating) else jnp.float32

    # Fold the divide: o = x * scale + bias, scale = 1/std, bias = -mean/std.
    scale_c = 1.0 / std
    bias_c = -mean * scale_c

    # Lane-dense slab; split rows so the sublane axis is fully packed.
    r = _row_split_factor(nc, hw)
    rows, cols = nc * r, hw // r
    x2 = img.reshape(rows, cols)

    # Row j of the slab belongs to plane j // r, whose channel is (j // r) % C.
    scale_rows = jnp.repeat(jnp.tile(scale_c, n), r).reshape(rows, 1)
    bias_rows = jnp.repeat(jnp.tile(bias_c, n), r).reshape(rows, 1)

    in_item = jnp.dtype(img.dtype).itemsize
    out_item = jnp.dtype(out_dtype).itemsize
    bm, bn = _choose_blocks(rows, cols, max(in_item, out_item))
    grid = (pl.cdiv(rows, bm), pl.cdiv(cols, bn))

    # Double-buffered input + output tiles, plus headroom; clamp so we stay
    # under every generation's physical VMEM (v7x: 64 MiB) while lifting
    # v5e's 16 MiB scoped default when bigger tiles need it.
    tile_bytes = bm * bn * (in_item + out_item)
    vmem_limit = int(min(48 << 20, max(16 << 20, 3 * tile_bytes)))

    out2 = pl.pallas_call(
        _normalize_kernel,
        out_shape=jax.ShapeDtypeStruct((rows, cols), out_dtype),
        grid=grid,
        in_specs=[
            pl.BlockSpec((bm, bn), lambda i, j: (i, j)),
            pl.BlockSpec((bm, 1), lambda i, j: (i, 0)),   # resident across j
            pl.BlockSpec((bm, 1), lambda i, j: (i, 0)),   # resident across j
        ],
        out_specs=pl.BlockSpec((bm, bn), lambda i, j: (i, j)),
        compiler_params=pltpu.CompilerParams(
            dimension_semantics=("parallel", "parallel"),
            vmem_limit_bytes=vmem_limit),
    )(x2, scale_rows, bias_rows)

    return out2.reshape(n, c, h, w)


class Normalization:
    """Mirror of the PyTorch Normalization module."""

    def __init__(self, mean, std):
        self.mean = jnp.asarray(mean, jnp.float32).reshape(-1, 1, 1)
        self.std = jnp.asarray(std, jnp.float32).reshape(-1, 1, 1)

    def __call__(self, img):
        return normalize_nchw(img, self.mean, self.std)


if __name__ == "__main__":
    key = jax.random.PRNGKey(0)

    # Small NCHW feature map consistent with the module.
    N, C, H, W = 2, 4, 16, 16
    img = jax.random.normal(key, (N, C, H, W), dtype=jnp.float32)

    mean = [0.485, 0.456, 0.406, 0.5]
    std = [0.229, 0.224, 0.225, 0.25]

    norm = Normalization(mean, std)
    out = jax.block_until_ready(norm(img))

    # Pure-JAX reference check (same broadcasting as the PyTorch module).
    mean_a = jnp.asarray(mean, jnp.float32).reshape(1, C, 1, 1)
    std_a = jnp.asarray(std, jnp.float32).reshape(1, C, 1, 1)
    ref = (img - mean_a) / std_a

    assert out.shape == img.shape and out.dtype == img.dtype
    assert jnp.allclose(out, ref, rtol=1e-5, atol=1e-6), (
        float(jnp.max(jnp.abs(out - ref))))

    print("KERNEL_OK")
</pallas_src>

<mosaic_0001>
module attributes {stable_mosaic.version = 11 : i64} {
  func.func @_normalize_kernel(%arg0: i32, %arg1: i32, %arg2: memref<8x256xf32, #tpu.memory_space<vmem>>, %arg3: memref<8x1xf32, #tpu.memory_space<vmem>>, %arg4: memref<8x1xf32, #tpu.memory_space<vmem>>, %arg5: memref<8x256xf32, #tpu.memory_space<vmem>>) attributes {dimension_semantics = [#tpu.dimension_semantics<parallel>, #tpu.dimension_semantics<parallel>], iteration_bounds = array<i64: 1, 1>, scalar_prefetch = 0 : i64, scratch_operands = 0 : i64, tpu.core_type = #tpu.core_type<tc>, window_params = [{transform_indices = @transform_0, window_bounds = array<i64: 8, 256>}, {transform_indices = @transform_1, window_bounds = array<i64: 8, 1>}, {transform_indices = @transform_2, window_bounds = array<i64: 8, 1>}, {transform_indices = @transform_3, window_bounds = array<i64: 8, 256>}]} {
    %c0 = arith.constant 0 : index
    %c0_0 = arith.constant 0 : index
    %0 = vector.load %arg2[%c0, %c0_0] : memref<8x256xf32, #tpu.memory_space<vmem>>, vector<8x256xf32>
    %c0_1 = arith.constant 0 : index
    %c0_2 = arith.constant 0 : index
    %1 = vector.load %arg3[%c0_1, %c0_2] : memref<8x1xf32, #tpu.memory_space<vmem>>, vector<8x1xf32>
    %c0_3 = arith.constant 0 : index
    %c0_4 = arith.constant 0 : index
    %2 = vector.load %arg4[%c0_3, %c0_4] : memref<8x1xf32, #tpu.memory_space<vmem>>, vector<8x1xf32>
    %3 = vector.broadcast %1 : vector<8x1xf32> to vector<8x256xf32>
    %4 = arith.mulf %0, %3 : vector<8x256xf32>
    %5 = vector.broadcast %2 : vector<8x1xf32> to vector<8x256xf32>
    %6 = arith.addf %4, %5 : vector<8x256xf32>
    %c0_5 = arith.constant 0 : index
    %c0_6 = arith.constant 0 : index
    %7 = vector.load %arg5[%c0_5, %c0_6] : memref<8x256xf32, #tpu.memory_space<vmem>>, vector<8x256xf32>
    tpu.vector_store %arg5[%c0_5, %c0_6], %6 {strides = array<i32>} : memref<8x256xf32, #tpu.memory_space<vmem>>, vector<8x256xf32>,
    return
  }
  func.func @transform_0(%arg0: i32, %arg1: i32) -> (i32, i32) {
    %c0_i32 = arith.constant 0 : i32
    return %arg0, %arg1 : i32, i32
  }
  func.func @transform_1(%arg0: i32, %arg1: i32) -> (i32, i32) {
    %c0_i32 = arith.constant 0 : i32
    %c0_i32_0 = arith.constant 0 : i32
    return %arg0, %c0_i32 : i32, i32
  }
  func.func @transform_2(%arg0: i32, %arg1: i32) -> (i32, i32) {
    %c0_i32 = arith.constant 0 : i32
    %c0_i32_0 = arith.constant 0 : i32
    return %arg0, %c0_i32 : i32, i32
  }
  func.func @transform_3(%arg0: i32, %arg1: i32) -> (i32, i32) {
    %c0_i32 = arith.constant 0 : i32
    return %arg0, %arg1 : i32, i32
  }
}

</mosaic_0001>

<bundles_post_ra>
// kernel: tpu_custom_call.1
= control target key start
LH: loop header
LB: loop body
LE: loop exit
PB: predicated region body
PF: predicated region fallthrough
CT: control target
= control target key end

     0   :  { %v74_v1 = vmov 0   ;;  %s111_s0 = inlined_call_operand.vmem [shape: f32[8,256], index: 0, kind: input, shape index: {}]   ;;  %s112_s1 = inlined_call_operand.vmem [shape: f32[8,1], index: 1, kind: input, shape index: {}]   ;;  %s113_s2 = inlined_call_operand.vmem [shape: f32[8,1], index: 2, kind: input, shape index: {}]   ;;  %s114_s3 = inlined_call_operand.hbm [shape: f32[8,256], index: 3, kind: output, shape index: {}]  }
   0x1   :  { %v17_v0 = vld [vmem:[%s112_s1] sm:$0xff]  ;;  %51 = vset.pattern.permute.xlu0 %v74_v1 }
   0x2   :  { %8 = vsyncpa [#allocation3], 0  ;;  %21 = vperm.xlu0 %51, %v17_v0   ;;  %v18_v2 = vld [vmem:[%s113_s2] sm:$0xff]  ;;  %v16_v5 = vld [vmem:[%s111_s0 + $0x8] sm:$0xff]  ;;  %s75_s20 = smov [#allocation2]  }
   0x3   :  { %v15_v4 = vld [vmem:[%s111_s0] sm:$0xff]  ;;  %s41_s1 = sshll.u32 %s75_s20, 4  ;;  %s42_s1 = int_to_ptr.vmem [resolvable:$true] %s41_s1 }
   0x4   :  { %s52_s2 = scalar_lea.vmem %s42_s1, 256  ;;  %p57_p1 = scmp.lt.s32.totalorder %s42_s1, %s42_s1 }
   0x5   :  { %p53_p0 = scmp.ne.s32.totalorder %s42_s1, %s52_s2  ;;  %p58_p2 = scmp.lt.s32.totalorder %s52_s2, %s52_s2 }
   0x6   :  { %28 = vperm.xlu0 %51, %v18_v2  }
   0x7   :  { %p59_p3 = por %p58_p2, %p57_p1 }
   0x9   :  { %p60_p4 = pnand %p59_p3, %p53_p0 }
  0x7d   :  { %v22_v3 = vpop.permute.xlu0 %21 }
  0x7e   :  { %v24_v6 = vmul.f32 %v22_v3, %v15_v4  ;;  %v25_v7 = vmul.f32 %v22_v3, %v16_v5 }
  0x81   :  { %v29_v8 = vpop.permute.xlu0 %28 }
  0x82   :  { %v31_v9 = vadd.f32 %v29_v8, %v24_v6  ;;  %v32_v10 = vadd.f32 %v29_v8, %v25_v7 }
  0x84   :  { %33 = vst [vmem:[#allocation2] sm:$0xff] %v31_v9  ;;  %34 = vst [vmem:[#allocation2 + $0x8] sm:$0xff] %v32_v10 }
  0x85   :  { %63 = shalt.err (!%p60_p4)
}
  0x86   :  { %44 = dma.vmem_to_hbm [thread:$0]  %s42_s1, 256, %s114_s3, [#allocation3]  }
  0x87   :  { %72 = dma.done.wait [#allocation3], 256  }
  0x88   :  { %73 = vsyncadd [#allocation3], 4294967040 }
  0x89   :  { %48 = vsyncpa [#allocation3], 1 }

</bundles_post_ra>
